<compile_context>
chip_gen: v7x
topology: tpu7x:2x2x1
jax: 0.10.0
libtpu: 0.0.40
codegen_flags: <defaults>
</compile_context>

<pallas_src>
import functools

import jax
import jax.numpy as jnp
import numpy as np
from jax.experimental import pallas as pl
from jax.experimental.pallas import tpu as pltpu

_LANES = 128


def _reg_kernel(x_ref, w_ref, b_ref, o_ref, *, k_features, needs_mask):
    """One (batch-tile, K-tile) step: o += sum(x * w, axis=-1); + bias at end."""
    k_idx = pl.program_id(1)

    @pl.when(k_idx == 0)
    def _init():
        o_ref[...] = jnp.zeros_like(o_ref)

    # VPU multiply with sublane-broadcast of the (1, tk) weight row.
    xw = x_ref[...].astype(jnp.float32) * w_ref[...]            # (tb, tk)
    if needs_mask:
        tk = x_ref.shape[-1]
        col = jax.lax.broadcasted_iota(jnp.int32, xw.shape, 1) + k_idx * tk
        xw = jnp.where(col < k_features, xw, 0.0)               # mask K remainder
    # Lane reduction goes to the XLU; broadcasting the (tb, 1) partial sum
    # across 128 lanes keeps the output stores lane-dense (only col 0 is real).
    o_ref[...] += jnp.sum(xw, axis=-1, keepdims=True)

    @pl.when(k_idx == pl.num_programs(1) - 1)
    def _finalize():
        o_ref[...] += b_ref[...]


def prepare_reg_params(weight, bias):
    """One-time parameter preprocessing (hoisted off the per-call hot path)."""
    assert weight.ndim == 2 and weight.shape[0] == 1
    w = weight.astype(jnp.float32)                  # compact (1, K)
    b = bias.reshape(1, 1).astype(jnp.float32)      # (1, 1)
    return w, b


def reg_layer_forward(x, w, b, *, max_tb=256, max_tk=4096):
    """y = x @ w.T + b  with  x: [B, K], w: [1, K] f32, b: [1, 1] f32 -> [B, 1]."""
    B, K = x.shape
    assert w.shape == (1, K) and b.shape == (1, 1)

    # Batch tiling: full extent when small (exempt from the sublane-8 rule),
    # otherwise 256-row tiles (multiple of 8) so v7x can split across its TCs.
    tb = B if B <= max_tb else max_tb
    n_b = -(-B // tb)
    # K tiling: a single full-extent tile when it fits comfortably in VMEM,
    # otherwise 128-aligned tiles with an in-kernel mask for the remainder.
    if K <= max_tk:
        tk, needs_mask = K, False
    else:
        tk, needs_mask = max_tk, (K % max_tk != 0)
    n_k = -(-K // tk)

    kernel = functools.partial(_reg_kernel, k_features=K, needs_mask=needs_mask)

    cost = pl.CostEstimate(
        flops=2 * B * K,
        transcendentals=0,
        bytes_accessed=(x.size * x.dtype.itemsize
                        + 4 * (w.size + b.size + B * _LANES)),
    )

    out = pl.pallas_call(
        kernel,
        out_shape=jax.ShapeDtypeStruct((B, _LANES), jnp.float32),
        grid_spec=pltpu.PrefetchScalarGridSpec(
            num_scalar_prefetch=0,
            grid=(n_b, n_k),
            in_specs=[
                pl.BlockSpec((tb, tk), lambda bi, ki: (bi, ki)),   # x: stream tiles
                pl.BlockSpec((1, tk), lambda bi, ki: (0, ki)),     # compact weight
                pl.BlockSpec((1, 1), lambda bi, ki: (0, 0)),       # bias, resident
            ],
            out_specs=pl.BlockSpec((tb, _LANES), lambda bi, ki: (bi, 0)),
        ),
        compiler_params=pltpu.CompilerParams(
            dimension_semantics=("parallel", "arbitrary"),  # batch ||, K reduction
            vmem_limit_bytes=32 * 1024 * 1024,
        ),
        cost_estimate=cost,
    )(x, w, b)

    # Only lane 0 of the lane-dense output block is meaningful.
    return out[:, :1]


def reference(x, weight, bias):
    return x.astype(jnp.float32) @ weight.astype(jnp.float32).T + bias.astype(jnp.float32)


if __name__ == "__main__":
    key = jax.random.PRNGKey(0)
    kx, kw, kb = jax.random.split(key, 3)

    # RegLayer(input_dim, hid_dim): hid_dim is unused by the module's forward.
    B, input_dim, hid_dim = 2, 2048, 32
    x = jax.random.normal(kx, (B, input_dim), jnp.float32)
    bound = 1.0 / np.sqrt(input_dim)                 # torch Linear default init range
    weight = jax.random.uniform(kw, (1, input_dim), jnp.float32, -bound, bound)
    bias = jax.random.uniform(kb, (1,), jnp.float32, -bound, bound)

    # Parameter prep done once, off the per-call path.
    w_prep, b_prep = prepare_reg_params(weight, bias)

    out = reg_layer_forward(x, w_prep, b_prep)       # grid (1, 1): single step
    out = jax.block_until_ready(out)

    ref = reference(x, weight, bias)
    np.testing.assert_allclose(np.asarray(out), np.asarray(ref), rtol=1e-4, atol=1e-4)
    assert out.shape == (B, 1)

    print("KERNEL_OK")
</pallas_src>

<mosaic_0001>
module attributes {stable_mosaic.version = 11 : i64} {
  func.func @_reg_kernel(%arg0: i32, %arg1: i32, %arg2: memref<2x2048xf32, #tpu.memory_space<vmem>>, %arg3: memref<1x2048xf32, #tpu.memory_space<vmem>>, %arg4: memref<1x1xf32, #tpu.memory_space<vmem>>, %arg5: memref<2x128xf32, #tpu.memory_space<vmem>>) attributes {dimension_semantics = [#tpu.dimension_semantics<parallel>, #tpu.dimension_semantics<arbitrary>], iteration_bounds = array<i64: 1, 1>, scalar_prefetch = 0 : i64, scratch_operands = 0 : i64, tpu.core_type = #tpu.core_type<tc>, window_params = [{transform_indices = @transform_0, window_bounds = array<i64: 2, 2048>}, {transform_indices = @transform_1, window_bounds = array<i64: 1, 2048>}, {pipeline_mode = #tpu.pipeline_mode<synchronous>, transform_indices = @transform_2, window_bounds = array<i64: 1, 1>}, {transform_indices = @transform_3, window_bounds = array<i64: 2, 128>}]} {
    %c0_i32 = arith.constant 0 : i32
    %0 = arith.cmpi eq, %arg1, %c0_i32 : i32
    %1 = arith.extui %0 : i1 to i32
    %c0_i32_0 = arith.constant 0 : i32
    %2 = arith.cmpi ne, %1, %c0_i32_0 : i32
    scf.if %2 {
      %cst_10 = arith.constant 0.000000e+00 : f32
      %16 = vector.broadcast %cst_10 : f32 to vector<2x128xf32>
      %c0_11 = arith.constant 0 : index
      %c0_12 = arith.constant 0 : index
      %17 = vector.load %arg5[%c0_11, %c0_12] : memref<2x128xf32, #tpu.memory_space<vmem>>, vector<2x128xf32>
      tpu.vector_store %arg5[%c0_11, %c0_12], %16 {strides = array<i32>} : memref<2x128xf32, #tpu.memory_space<vmem>>, vector<2x128xf32>,
    } else {
    }
    %c0 = arith.constant 0 : index
    %c0_1 = arith.constant 0 : index
    %3 = vector.load %arg2[%c0, %c0_1] : memref<2x2048xf32, #tpu.memory_space<vmem>>, vector<2x2048xf32>
    %c0_2 = arith.constant 0 : index
    %c0_3 = arith.constant 0 : index
    %4 = vector.load %arg3[%c0_2, %c0_3] : memref<1x2048xf32, #tpu.memory_space<vmem>>, vector<1x2048xf32>
    %5 = vector.broadcast %4 : vector<1x2048xf32> to vector<2x2048xf32>
    %6 = arith.mulf %3, %5 : vector<2x2048xf32>
    %c0_4 = arith.constant 0 : index
    %c0_5 = arith.constant 0 : index
    %7 = vector.load %arg5[%c0_4, %c0_5] : memref<2x128xf32, #tpu.memory_space<vmem>>, vector<2x128xf32>
    %cst = arith.constant dense<0.000000e+00> : vector<2xf32>
    %8 = vector.multi_reduction <add>, %6, %cst [1] : vector<2x2048xf32> to vector<2xf32>
    %9 = vector.shape_cast %8 : vector<2xf32> to vector<2x1xf32>
    %10 = vector.broadcast %9 : vector<2x1xf32> to vector<2x128xf32>
    %11 = arith.addf %7, %10 : vector<2x128xf32>
    %c0_6 = arith.constant 0 : index
    %c0_7 = arith.constant 0 : index
    %12 = vector.load %arg5[%c0_6, %c0_7] : memref<2x128xf32, #tpu.memory_space<vmem>>, vector<2x128xf32>
    tpu.vector_store %arg5[%c0_6, %c0_7], %11 {strides = array<i32>} : memref<2x128xf32, #tpu.memory_space<vmem>>, vector<2x128xf32>,
    %c0_i32_8 = arith.constant 0 : i32
    %13 = arith.cmpi eq, %arg1, %c0_i32_8 : i32
    %14 = arith.extui %13 : i1 to i32
    %c0_i32_9 = arith.constant 0 : i32
    %15 = arith.cmpi ne, %14, %c0_i32_9 : i32
    scf.if %15 {
      %c0_10 = arith.constant 0 : index
      %c0_11 = arith.constant 0 : index
      %16 = vector.load %arg5[%c0_10, %c0_11] : memref<2x128xf32, #tpu.memory_space<vmem>>, vector<2x128xf32>
      %c0_12 = arith.constant 0 : index
      %c0_13 = arith.constant 0 : index
      %17 = vector.load %arg4[%c0_12, %c0_13] : memref<1x1xf32, #tpu.memory_space<vmem>>, vector<1x1xf32>
      %18 = vector.broadcast %17 : vector<1x1xf32> to vector<2x128xf32>
      %19 = arith.addf %16, %18 : vector<2x128xf32>
      %c0_14 = arith.constant 0 : index
      %c0_15 = arith.constant 0 : index
      %20 = vector.load %arg5[%c0_14, %c0_15] : memref<2x128xf32, #tpu.memory_space<vmem>>, vector<2x128xf32>
      tpu.vector_store %arg5[%c0_14, %c0_15], %19 {strides = array<i32>} : memref<2x128xf32, #tpu.memory_space<vmem>>, vector<2x128xf32>,
    } else {
    }
    return
  }
  func.func @transform_0(%arg0: i32, %arg1: i32) -> (i32, i32) {
    %c0_i32 = arith.constant 0 : i32
    return %arg0, %arg1 : i32, i32
  }
  func.func @transform_1(%arg0: i32, %arg1: i32) -> (i32, i32) {
    %c0_i32 = arith.constant 0 : i32
    %c0_i32_0 = arith.constant 0 : i32
    return %c0_i32, %arg1 : i32, i32
  }
  func.func @transform_2(%arg0: i32, %arg1: i32) -> (i32, i32) {
    %c0_i32 = arith.constant 0 : i32
    %c0_i32_0 = arith.constant 0 : i32
    %c0_i32_1 = arith.constant 0 : i32
    return %c0_i32, %c0_i32_0 : i32, i32
  }
  func.func @transform_3(%arg0: i32, %arg1: i32) -> (i32, i32) {
    %c0_i32 = arith.constant 0 : i32
    %c0_i32_0 = arith.constant 0 : i32
    return %arg0, %c0_i32 : i32, i32
  }
}

</mosaic_0001>

<bundles_post_ra>
// kernel: tpu_custom_call.1
= control target key start
LH: loop header
LB: loop body
LE: loop exit
PB: predicated region body
PF: predicated region fallthrough
CT: control target
= control target key end

     0   :  { %s530_s0 = inlined_call_operand.hbm [shape: f32[2,2048], index: 0, kind: input, shape index: {}]   ;;  %s531_s1 = inlined_call_operand.hbm [shape: f32[1,2048], index: 1, kind: input, shape index: {}]   ;;  %s532_s2 = inlined_call_operand.<no memory space> [shape: f32[1,1], index: 2, kind: input, shape index: {}]   ;;  %s533_s3 = inlined_call_operand.hbm [shape: f32[2,128], index: 3, kind: output, shape index: {}]  }
   0x1   :  { %v8_v0 = vstv %s532_s2 }
   0x2   :  { %9 = vst [vmem:[#allocation2] sm:$0x1] %v8_v0 }
   0x3   :  { %10 = vsyncpa [#allocation4], 0 }
   0x4   :  { %11 = vsyncpa [#allocation7], 0 }
   0x5   :  { %12 = vsyncpa [#allocation5], 0  ;;  %s431_s14 = smov [#allocation3]   ;;  %s432_s16 = smov [#allocation6]  }
   0x6   :  { %s19_s15 = sshll.u32 %s431_s14, 4  ;;  %s29_s17 = sshll.u32 %s432_s16, 4  ;;  %s20_s15 = int_to_ptr.vmem [resolvable:$true] %s19_s15  ;;  %s30_s17 = int_to_ptr.vmem [resolvable:$true] %s29_s17 }
   0x7   :  { %s359_s20 = scalar_lea.hbm %s530_s0, 512 }
   0x8   :  { %p360_p0 = scmp.ne.s32.totalorder %s530_s0, %s359_s20  ;;  %p363_p1 = scmp.lt.u32.totalorder %s359_s20, %s530_s0 }
   0xa   :  { %p365_p2 = pnand %p363_p1, %p360_p0 }
   0xc   :  { %368 = shalt.err (!%p365_p2)
}
   0xd   :  { %s369_s24 = scalar_lea.vmem %s20_s15, 512  ;;  %p374_p4 = scmp.lt.s32.totalorder %s20_s15, %s20_s15 }
   0xe   :  { %p370_p3 = scmp.ne.s32.totalorder %s20_s15, %s369_s24  ;;  %p375_p5 = scmp.lt.s32.totalorder %s369_s24, %s369_s24 }
  0x10   :  { %p376_p6 = por %p375_p5, %p374_p4 }
  0x12   :  { %p377_p7 = pnand %p376_p6, %p370_p3 }
  0x14   :  { %380 = shalt.err (!%p377_p7)
}
  0x15   :  { %22 = dma.hbm_to_vmem [thread:$0]  %s530_s0, 512, %s20_s15, [#allocation4]  }
  0x16   :  { %s381_s29 = scalar_lea.hbm %s531_s1, 256 }
  0x17   :  { %p382_p8 = scmp.ne.s32.totalorder %s531_s1, %s381_s29  ;;  %p385_p9 = scmp.lt.u32.totalorder %s381_s29, %s531_s1 }
  0x19   :  { %p387_p10 = pnand %p385_p9, %p382_p8 }
  0x1b   :  { %390 = shalt.err (!%p387_p10)
}
  0x1c   :  { %s391_s7 = scalar_lea.vmem %s30_s17, 256  ;;  %p396_p12 = scmp.lt.s32.totalorder %s30_s17, %s30_s17 }
  0x1d   :  { %p392_p11 = scmp.ne.s32.totalorder %s30_s17, %s391_s7  ;;  %p397_p13 = scmp.lt.s32.totalorder %s391_s7, %s391_s7 }
  0x1f   :  { %p398_p0 = por %p397_p13, %p396_p12 }
  0x21   :  { %p399_p1 = pnand %p398_p0, %p392_p11 }
  0x23   :  { %402 = shalt.err (!%p399_p1)
}
  0x24   :  { %32 = dma.hbm_to_vmem [thread:$0]  %s531_s1, 256, %s30_s17, [#allocation7]  }
  0x25   :  { %425 = dma.done.wait [#allocation4], 512  }
  0x26   :  { %426 = vsyncadd [#allocation4], 4294966784 }
  0x27   :  { %427 = dma.done.wait [#allocation7], 256  }
  0x28   :  { %428 = vsyncadd [#allocation7], 4294967040  ;;  %v54_v1 = vlaneseq  ;;  %v433_v2 = vmov 1983009808   ;;  %v434_v4 = vmov 0   ;;  %v435_v6 = vmov 0.0  }
  0x29   :  { %v121_v3 = vunpack.c.l.s4 %v433_v2  ;;  %358 = vset.pattern.permute.xlu0 %v434_v4  ;;  %45 = vst [vmem:[#allocation8] sm:$0x3] %v435_v6  ;;  %v50_v16 = vld [vmem:[#allocation6] sm:$0xff]  ;;  %v51_v17 = vld [vmem:[#allocation6 + $0x8] sm:$0xff]  ;;  %vm283_vm0 = vcmask 1041408   ;;  %v48_v62 = vld [vmem:[#allocation3 + $0x10] sm:$0xff] }
  0x2a   :  { %v55_v5 = vshrl.u32 %v54_v1, 7  ;;  %v46_v41 = vld [vmem:[#allocation3] sm:$0xff]  ;;  %v47_v42 = vld [vmem:[#allocation3 + $0x8] sm:$0xff]  ;;  %s436_s1 = smov [#allocation8]  }
  0x2b   :  { %v122_v7 = vunpack.c.0.s8 %v121_v3  ;;  %s341_s9 = sshll.u32 %s436_s1, 4  ;;  %s342_s9 = int_to_ptr.vmem [resolvable:$true] %s341_s9 }
  0x2c   :  { %v56_v8 = vsub.s32 0, %v55_v5  ;;  %v60_v9 = vsub.s32 1, %v55_v5  ;;  %v64_v10 = vsub.s32 2, %v55_v5  ;;  %v68_v11 = vsub.s32 3, %v55_v5  ;;  %s403_s10 = scalar_lea.vmem %s342_s9, 32  ;;  %p408_p3 = scmp.lt.s32.totalorder %s342_s9, %s342_s9 }
  0x2d   :  { %v72_v12 = vsub.s32 4, %v55_v5  ;;  %v76_v13 = vsub.s32 5, %v55_v5  ;;  %v80_v14 = vsub.s32 6, %v55_v5  ;;  %v84_v15 = vsub.s32 7, %v55_v5  ;;  %p404_p2 = scmp.ne.s32.totalorder %s342_s9, %s403_s10  ;;  %p409_p4 = scmp.lt.s32.totalorder %s403_s10, %s403_s10 }
  0x2e   :  { %v484_v18 = vsub.s32 %v122_v7, %v55_v5  ;;  %v57_v19 = vrot.slane %v50_v16, %v56_v8  ;;  %v61_v20 = vrot.slane %v50_v16, %v60_v9  ;;  %v65_v21 = vrot.slane %v50_v16, %v64_v10 }
  0x2f   :  { %v69_v22 = vrot.slane %v50_v16, %v68_v11  ;;  %v73_v23 = vrot.slane %v50_v16, %v72_v12  ;;  %v77_v24 = vrot.slane %v50_v16, %v76_v13  ;;  %v81_v25 = vrot.slane %v50_v16, %v80_v14  ;;  %p410_p5 = por %p409_p4, %p408_p3 }
  0x30   :  { %v85_v26 = vrot.slane %v50_v16, %v84_v15  ;;  %v89_v27 = vrot.slane %v51_v17, %v56_v8  ;;  %v93_v28 = vrot.slane %v51_v17, %v60_v9  ;;  %v97_v29 = vrot.slane %v51_v17, %v64_v10 }
  0x31   :  { %v101_v30 = vrot.slane %v51_v17, %v68_v11  ;;  %v118_v31 = vcombine.low %v57_v19, %v61_v20  ;;  %v119_v32 = vcombine.low %v65_v21, %v69_v22  ;;  %v135_v33 = vcombine.low %v73_v23, %v77_v24  ;;  %v49_v19 = vld [vmem:[#allocation3 + $0x18] sm:$0xff]  ;;  %p411_p6 = pnand %p410_p5, %p404_p2 }
  0x32   :  { %v136_v34 = vcombine.low %v81_v25, %v85_v26  ;;  %v152_v35 = vcombine.low %v89_v27, %v93_v28  ;;  %v105_v43 = vrot.slane %v51_v17, %v72_v12  ;;  %v109_v44 = vrot.slane %v51_v17, %v76_v13 }
  0x33   :  { %v153_v36 = vcombine.low %v97_v29, %v101_v30  ;;  %v126_v37 = vrot.slane %v118_v31, %v484_v18  ;;  %v133_v38 = vrot.slane %v119_v32, %v484_v18  ;;  %v143_v39 = vrot.slane %v135_v33, %v484_v18 }
  0x34   :  { %v150_v40 = vrot.slane %v136_v34, %v484_v18  ;;  %v113_v47 = vrot.slane %v51_v17, %v80_v14  ;;  %v117_v48 = vrot.slane %v51_v17, %v84_v15  ;;  %v160_v49 = vrot.slane %v152_v35, %v484_v18 }
  0x35   :  { %v134_v45 = vcombine.low %v126_v37, %v133_v38  ;;  %v167_v50 = vrot.slane %v153_v36, %v484_v18  ;;  %v169_v56 = vcombine.low %v105_v43, %v109_v44 }
  0x36   :  { %v151_v46 = vcombine.low %v143_v39, %v150_v40  ;;  %v170_v57 = vcombine.low %v113_v47, %v117_v48 }
  0x37   :  { %v190_v51 = vmul.f32 %v134_v45, %v46_v41  ;;  %v168_v55 = vcombine.low %v160_v49, %v167_v50  ;;  %v177_v2 = vrot.slane %v169_v56, %v484_v18 }
  0x38   :  { %v191_v52 = vmul.f32 %v151_v46, %v47_v42  ;;  %v184_v3 = vrot.slane %v170_v57, %v484_v18 }
  0x39   :  { %v199_v53 = vcombine.high %v190_v51, %v190_v51  ;;  %v206_v54 = vrot.slane %v190_v51, %v484_v18  ;;  %v192_v6 = vmul.f32 %v168_v55, %v48_v62  ;;  %v194_v51 = vld [vmem:[#allocation8] sm:$0x3] }
  0x3a   :  { %v216_v60 = vcombine.high %v191_v52, %v191_v52  ;;  %v223_v61 = vrot.slane %v191_v52, %v484_v18  ;;  %v185_v12 = vcombine.low %v177_v2, %v184_v3 }
  0x3b   :  { %v213_v58 = vrot.slane %v199_v53, %v484_v18  ;;  %v214_v59 = vcombine.high %v206_v54, %v206_v54  ;;  %v284_v0 = vsel %vm283_vm0, %v206_v54, 0.0  ;;  %v233_v15 = vcombine.high %v192_v6, %v192_v6 }
  0x3c   :  { %v230_v7 = vrot.slane %v216_v60, %v484_v18  ;;  %v231_v8 = vcombine.high %v223_v61, %v223_v61  ;;  %v291_v11 = vsel %vm283_vm0, %v223_v61, 0.0  ;;  %v240_v16 = vrot.slane %v192_v6, %v484_v18 }
  0x3d   :  { %v215_v63 = vcombine.high %v213_v58, %v213_v58  ;;  %v285_v1 = vsel %vm283_vm0, %v214_v59, 0.0  ;;  %v287_v5 = vsel %vm283_vm0, %v213_v58, 0.0  ;;  %v193_v23 = vmul.f32 %v185_v12, %v49_v19 }
  0x3e   :  { %v286_v4 = vadd.f32 %v285_v1, %v284_v0  ;;  %v232_v14 = vcombine.high %v230_v7, %v230_v7  ;;  %v293_v17 = vsel %vm283_vm0, %v231_v8, 0.0  ;;  %v295_v21 = vsel %vm283_vm0, %v230_v7, 0.0 }
  0x3f   :  { %v289_v9 = vsel %vm283_vm0, %v215_v63, 0.0  ;;  %v247_v24 = vrot.slane %v233_v15, %v484_v18  ;;  %v248_v25 = vcombine.high %v240_v16, %v240_v16  ;;  %v299_v28 = vsel %vm283_vm0, %v240_v16, 0.0 }
  0x40   :  { %v288_v10 = vadd.f32 %v287_v5, %v286_v4  ;;  %v297_v26 = vsel %vm283_vm0, %v232_v14, 0.0  ;;  %v250_v31 = vcombine.high %v193_v23, %v193_v23  ;;  %v257_v32 = vrot.slane %v193_v23, %v484_v18 }
  0x41   :  { %v249_v30 = vcombine.high %v247_v24, %v247_v24  ;;  %v301_v33 = vsel %vm283_vm0, %v248_v25, 0.0  ;;  %v303_v35 = vsel %vm283_vm0, %v247_v24, 0.0 }
  0x42   :  { %v290_v13 = vadd.f32 %v289_v9, %v288_v10  ;;  %v264_v37 = vrot.slane %v250_v31, %v484_v18  ;;  %v265_v38 = vcombine.high %v257_v32, %v257_v32  ;;  %v307_v41 = vsel %vm283_vm0, %v257_v32, 0.0  ;;  %v351_v18 = vld [vmem:[#allocation2] ss:$0 sm:$0xff] }
  0x43   :  { %v305_v39 = vsel %vm283_vm0, %v249_v30, 0.0 }
  0x44   :  { %v292_v20 = vadd.f32 %v291_v11, %v290_v13  ;;  %v266_v43 = vcombine.high %v264_v37, %v264_v37  ;;  %v309_v44 = vsel %vm283_vm0, %v265_v38, 0.0  ;;  %v311_v46 = vsel %vm283_vm0, %v264_v37, 0.0 }
  0x46   :  { %v294_v22 = vadd.f32 %v293_v17, %v292_v20  ;;  %v313_v48 = vsel %vm283_vm0, %v266_v43, 0.0 }
  0x48   :  { %v296_v27 = vadd.f32 %v295_v21, %v294_v22 }
  0x4a   :  { %v298_v29 = vadd.f32 %v297_v26, %v296_v27 }
  0x4c   :  { %v300_v34 = vadd.f32 %v299_v28, %v298_v29 }
  0x4e   :  { %v302_v36 = vadd.f32 %v301_v33, %v300_v34 }
  0x50   :  { %v304_v40 = vadd.f32 %v303_v35, %v302_v36 }
  0x52   :  { %v306_v42 = vadd.f32 %v305_v39, %v304_v40 }
  0x54   :  { %v308_v45 = vadd.f32 %v307_v41, %v306_v42 }
  0x56   :  { %v310_v47 = vadd.f32 %v309_v44, %v308_v45 }
  0x58   :  { %v312_v49 = vadd.f32 %v311_v46, %v310_v47 }
  0x5a   :  { %v314_v50 = vadd.f32 %v313_v48, %v312_v49 }
  0x5c   :  { %315 = vadd.xlane.f32.xlu0 %v314_v50 }
  0x72   :  { %330 = vperm.xlu0 %358, %v351_v18  }
  0xe9   :  { %v316_v52 = vpop.xlane.xlu0 %315 }
  0xea   :  { %v317_v53 = vadd.f32 %v316_v52, %v194_v51 }
  0xec   :  { %318 = vst [vmem:[#allocation8] sm:$0x3] %v317_v53 }
  0xf1   :  { %v331_v54 = vpop.permute.xlu0 %330 }
  0xf3   :  { %v322_v55 = vld [vmem:[#allocation8] sm:$0x3] }
  0xf4   :  { %v333_v56 = vadd.f32 %v331_v54, %v322_v55 }
  0xf6   :  { %334 = vst [vmem:[#allocation8] sm:$0x3] %v333_v56 }
  0xf7   :  { %414 = shalt.err (!%p411_p6)
}
  0xf8   :  { %s415_s13 = scalar_lea.hbm %s533_s3, 32 }
  0xf9   :  { %p416_p7 = scmp.ne.s32.totalorder %s533_s3, %s415_s13  ;;  %p419_p8 = scmp.lt.u32.totalorder %s415_s13, %s533_s3 }
  0xfb   :  { %p421_p9 = pnand %p419_p8, %p416_p7 }
  0xfd   :  { %424 = shalt.err (!%p421_p9)
}
  0xfe   :  { %344 = dma.vmem_to_hbm [thread:$0]  %s342_s9, 32, %s533_s3, [#allocation5]  }
  0xff   :  { %429 = dma.done.wait [#allocation5], 32  }
 0x100   :  { %430 = vsyncadd [#allocation5], 4294967264 }
 0x101   :  { %348 = vsyncpa [#allocation4], 1 }
 0x102   :  { %349 = vsyncpa [#allocation7], 1 }
 0x103   :  { %350 = vsyncpa [#allocation5], 1 }

</bundles_post_ra>
